<compile_context>
chip_gen: v7x
topology: tpu7x:2x2x1
jax: 0.10.0
libtpu: 0.0.40
codegen_flags: <defaults>
</compile_context>

<pallas_src>
import functools

import jax
import jax.numpy as jnp
from jax import lax
from jax.experimental import pallas as pl
from jax.experimental.pallas import tpu as pltpu


def _round_up(a: int, b: int) -> int:
    return (a + b - 1) // b * b


_VMEM_CAP_CACHE = []


def _vmem_capacity_bytes() -> int:
    """Per-core VMEM capacity; conservative (v7x-sized) fallback if the query fails."""
    if not _VMEM_CAP_CACHE:
        try:
            _VMEM_CAP_CACHE.append(int(pltpu.get_tpu_info().vmem_capacity_bytes))
        except Exception:
            _VMEM_CAP_CACHE.append(64 * 1024 * 1024)
    return _VMEM_CAP_CACHE[0]


def _maybe_pad2d(a, rows, cols):
    pr, pc = rows - a.shape[0], cols - a.shape[1]
    if pr == 0 and pc == 0:
        return a                      # skip the extra HBM round-trip when aligned
    return jnp.pad(a, ((0, pr), (0, pc)))


def _cclinear_kernel(x_ref, w_ref, xmu_ref, b_ref, o_ref, acc_ref):
    # grid = (i: M tiles [parallel], j: N tiles [parallel], k: K tiles [arbitrary])
    # x_ref  : (tm, tk)   input-row tile (raw dtype)
    # w_ref  : (tn, tk)   RAW (un-centered) weight tile
    # xmu_ref: (tm, 1)    precomputed per-row correction x . mu  (f32, k/j-invariant)
    # b_ref  : (1, tn)    centered bias tile (f32, k/i-invariant)
    # o_ref  : (tm, tn)   output tile
    # acc_ref: (tm, tn)   f32 accumulator scratch
    k = pl.program_id(2)

    @pl.when(k == 0)
    def _():
        acc_ref[...] = jnp.zeros_like(acc_ref)

    # 'NT' contraction on K (last dim of both tiles) -> MXU-native, f32 accumulation.
    dn = (((1,), (1,)), ((), ()))
    acc_ref[...] += lax.dot_general(x_ref[...], w_ref[...], dn,
                                    preferred_element_type=jnp.float32)

    @pl.when(k == pl.num_programs(2) - 1)
    def _():
        # Rank-1 centering correction + centered bias, then cast to output dtype.
        o_ref[...] = (acc_ref[...] - xmu_ref[...] + b_ref[...]).astype(o_ref.dtype)


@functools.partial(jax.jit, static_argnames=("block_m", "block_n", "block_k"))
def cclinear_repara(x, v_weight, v_bias, block_m=None, block_n=512, block_k=2048):
    """x: (..., in_features); v_weight: (N, K); v_bias: (N,) -> (..., N)."""
    orig_shape = x.shape
    K = orig_shape[-1]
    N, Kw = v_weight.shape
    assert Kw == K, "v_weight last dim must match x last dim"
    x2d = x.reshape(-1, K)
    M = x2d.shape[0]

    # Single matmul dtype for both operands (avoid implicit mixed-dtype MXU feeds).
    mm_dtype = jnp.promote_types(x.dtype, v_weight.dtype)
    out_dtype = mm_dtype
    x2d = x2d.astype(mm_dtype)
    w = v_weight.astype(mm_dtype)

    # ---- loop-invariant centering terms (tiny one-shot XLA ops, all in f32) -------
    mu32 = jnp.mean(v_weight.astype(jnp.float32), axis=0, keepdims=True)   # (1, K)
    vb32 = v_bias.astype(jnp.float32)
    b_c = (vb32 - jnp.mean(vb32)).reshape(1, N)                            # (1, N) f32
    # Per-row correction, hoisted entirely out of the kernel's (i, j, k) loop.
    xmu = jnp.dot(x2d.astype(jnp.float32), mu32.T)                         # (M, 1) f32

    # ---- generation-aware tile selection -------------------------------------------
    vmem_cap = _vmem_capacity_bytes()
    big_vmem = vmem_cap >= 100 * 1024 * 1024          # v5e/v6e (128 MiB) vs v7x (64 MiB)
    if block_m is None:
        block_m = 1024 if big_vmem else 512           # bigger row tile => fewer W re-reads
    vmem_limit = max(32 * 1024 * 1024,
                     min(vmem_cap * 3 // 4, 100 * 1024 * 1024))

    sub = 16 if mm_dtype == jnp.bfloat16 else 8       # sublane multiple
    tm = min(_round_up(block_m, sub), _round_up(M, sub))
    tn = min(_round_up(block_n, 128), _round_up(N, 128))
    tk_target = _round_up(block_k, 128)
    Kp0 = _round_up(K, 128)
    if Kp0 <= tk_target:
        tk, Kp = Kp0, Kp0
    else:
        tk, Kp = tk_target, _round_up(K, tk_target)
    Mp = _round_up(M, tm)
    Np = _round_up(N, tn)

    # ---- pad only when needed (padding is mathematically inert here) ---------------
    x_p = _maybe_pad2d(x2d, Mp, Kp)
    w_p = _maybe_pad2d(w, Np, Kp)
    xmu_p = _maybe_pad2d(xmu, Mp, 1)
    b_p = _maybe_pad2d(b_c, 1, Np)

    gm, gn, gk = Mp // tm, Np // tn, Kp // tk
    in_item = jnp.dtype(mm_dtype).itemsize
    cost = pl.CostEstimate(
        flops=2 * Mp * Np * Kp,
        transcendentals=0,
        bytes_accessed=(gn * Mp * Kp + gm * Np * Kp) * in_item
        + Mp * Np * jnp.dtype(out_dtype).itemsize,
    )

    out = pl.pallas_call(
        _cclinear_kernel,
        out_shape=jax.ShapeDtypeStruct((Mp, Np), out_dtype),
        grid_spec=pltpu.PrefetchScalarGridSpec(
            num_scalar_prefetch=0,
            grid=(gm, gn, gk),
            in_specs=[
                pl.BlockSpec((tm, tk), lambda i, j, k: (i, k)),   # x row tile
                pl.BlockSpec((tn, tk), lambda i, j, k: (j, k)),   # raw weight tile
                pl.BlockSpec((tm, 1), lambda i, j, k: (i, 0)),    # per-row x.mu (f32)
                pl.BlockSpec((1, tn), lambda i, j, k: (0, j)),    # centered bias (f32)
            ],
            out_specs=pl.BlockSpec((tm, tn), lambda i, j, k: (i, j)),
            scratch_shapes=[pltpu.VMEM((tm, tn), jnp.float32)],
        ),
        compiler_params=pltpu.CompilerParams(
            dimension_semantics=("parallel", "parallel", "arbitrary"),
            vmem_limit_bytes=int(vmem_limit),
        ),
        cost_estimate=cost,
    )(x_p, w_p, xmu_p, b_p)

    return out[:M, :N].reshape(*orig_shape[:-1], N)


def _init_params(key, in_features, out_features, dtype=jnp.float32):
    """Deterministic init mirroring nn.Linear-style kaiming_uniform(a=sqrt(5))."""
    kw, kb = jax.random.split(key)
    bound = 1.0 / jnp.sqrt(jnp.array(in_features, dtype=jnp.float32))
    v_weight = jax.random.uniform(
        kw, (out_features, in_features), dtype=dtype, minval=-bound, maxval=bound)
    v_bias = jax.random.uniform(
        kb, (out_features,), dtype=dtype, minval=-bound, maxval=bound)
    return v_weight, v_bias


if __name__ == "__main__":
    key = jax.random.PRNGKey(0)
    k_x, k_p = jax.random.split(key)

    batch, seq, in_features, out_features = 2, 8, 32, 16
    x = jax.random.normal(k_x, (batch, seq, in_features), dtype=jnp.float32)
    v_weight, v_bias = _init_params(k_p, in_features, out_features)

    y = cclinear_repara(x, v_weight, v_bias)
    y = jax.block_until_ready(y)

    # Pure-JAX reference of the PyTorch forward pass.
    w_ref = v_weight - jnp.mean(v_weight, axis=0, keepdims=True)
    b_ref = v_bias - jnp.mean(v_bias)
    y_ref = x @ w_ref.T + b_ref

    assert y.shape == (batch, seq, out_features)
    assert jnp.allclose(y, y_ref, atol=1e-5, rtol=1e-5)
    print("KERNEL_OK")
</pallas_src>

<mosaic_0001>
module attributes {stable_mosaic.version = 11 : i64} {
  func.func @_cclinear_kernel(%arg0: i32, %arg1: i32, %arg2: i32, %arg3: memref<16x128xf32, #tpu.memory_space<vmem>>, %arg4: memref<128x128xf32, #tpu.memory_space<vmem>>, %arg5: memref<16x1xf32, #tpu.memory_space<vmem>>, %arg6: memref<1x128xf32, #tpu.memory_space<vmem>>, %arg7: memref<16x128xf32, #tpu.memory_space<vmem>>, %arg8: memref<16x128xf32, #tpu.memory_space<vmem>>) attributes {dimension_semantics = [#tpu.dimension_semantics<parallel>, #tpu.dimension_semantics<parallel>, #tpu.dimension_semantics<arbitrary>], iteration_bounds = array<i64: 1, 1, 1>, scalar_prefetch = 0 : i64, scratch_operands = 1 : i64, tpu.core_type = #tpu.core_type<tc>, window_params = [{transform_indices = @transform_0, window_bounds = array<i64: 16, 128>}, {transform_indices = @transform_1, window_bounds = array<i64: 128, 128>}, {transform_indices = @transform_2, window_bounds = array<i64: 16, 1>}, {transform_indices = @transform_3, window_bounds = array<i64: 1, 128>}, {transform_indices = @transform_4, window_bounds = array<i64: 16, 128>}]} {
    %c0_i32 = arith.constant 0 : i32
    %0 = arith.cmpi eq, %arg2, %c0_i32 : i32
    %1 = arith.extui %0 : i1 to i32
    %c0_i32_0 = arith.constant 0 : i32
    %2 = arith.cmpi ne, %1, %c0_i32_0 : i32
    scf.if %2 {
      %cst_10 = arith.constant 0.000000e+00 : f32
      %12 = vector.broadcast %cst_10 : f32 to vector<16x128xf32>
      %c0_11 = arith.constant 0 : index
      %c0_12 = arith.constant 0 : index
      %13 = vector.load %arg8[%c0_11, %c0_12] : memref<16x128xf32, #tpu.memory_space<vmem>>, vector<16x128xf32>
      tpu.vector_store %arg8[%c0_11, %c0_12], %12 {strides = array<i32>} : memref<16x128xf32, #tpu.memory_space<vmem>>, vector<16x128xf32>,
    } else {
    }
    %c0 = arith.constant 0 : index
    %c0_1 = arith.constant 0 : index
    %3 = vector.load %arg8[%c0, %c0_1] : memref<16x128xf32, #tpu.memory_space<vmem>>, vector<16x128xf32>
    %c0_2 = arith.constant 0 : index
    %c0_3 = arith.constant 0 : index
    %4 = vector.load %arg3[%c0_2, %c0_3] : memref<16x128xf32, #tpu.memory_space<vmem>>, vector<16x128xf32>
    %c0_4 = arith.constant 0 : index
    %c0_5 = arith.constant 0 : index
    %5 = vector.load %arg4[%c0_4, %c0_5] : memref<128x128xf32, #tpu.memory_space<vmem>>, vector<128x128xf32>
    %cst = arith.constant dense<0.000000e+00> : vector<16x128xf32>
    %6 = tpu.matmul %4, %5, %cst {dimension_numbers = #tpu.dot_dimension_numbers<[1], [1], [0], [0], [0, 0, 1, 0], [], []>} : vector<16x128xf32>, vector<128x128xf32>, vector<16x128xf32> -> vector<16x128xf32>
    %7 = arith.addf %3, %6 : vector<16x128xf32>
    %c0_6 = arith.constant 0 : index
    %c0_7 = arith.constant 0 : index
    %8 = vector.load %arg8[%c0_6, %c0_7] : memref<16x128xf32, #tpu.memory_space<vmem>>, vector<16x128xf32>
    tpu.vector_store %arg8[%c0_6, %c0_7], %7 {strides = array<i32>} : memref<16x128xf32, #tpu.memory_space<vmem>>, vector<16x128xf32>,
    %c0_i32_8 = arith.constant 0 : i32
    %9 = arith.cmpi eq, %arg2, %c0_i32_8 : i32
    %10 = arith.extui %9 : i1 to i32
    %c0_i32_9 = arith.constant 0 : i32
    %11 = arith.cmpi ne, %10, %c0_i32_9 : i32
    scf.if %11 {
      %c0_10 = arith.constant 0 : index
      %c0_11 = arith.constant 0 : index
      %12 = vector.load %arg8[%c0_10, %c0_11] : memref<16x128xf32, #tpu.memory_space<vmem>>, vector<16x128xf32>
      %c0_12 = arith.constant 0 : index
      %c0_13 = arith.constant 0 : index
      %13 = vector.load %arg5[%c0_12, %c0_13] : memref<16x1xf32, #tpu.memory_space<vmem>>, vector<16x1xf32>
      %14 = vector.broadcast %13 : vector<16x1xf32> to vector<16x128xf32>
      %15 = arith.subf %12, %14 : vector<16x128xf32>
      %c0_14 = arith.constant 0 : index
      %c0_15 = arith.constant 0 : index
      %16 = vector.load %arg6[%c0_14, %c0_15] : memref<1x128xf32, #tpu.memory_space<vmem>>, vector<1x128xf32>
      %17 = vector.broadcast %16 : vector<1x128xf32> to vector<16x128xf32>
      %18 = arith.addf %15, %17 : vector<16x128xf32>
      %c0_16 = arith.constant 0 : index
      %c0_17 = arith.constant 0 : index
      %19 = vector.load %arg7[%c0_16, %c0_17] : memref<16x128xf32, #tpu.memory_space<vmem>>, vector<16x128xf32>
      tpu.vector_store %arg7[%c0_16, %c0_17], %18 {strides = array<i32>} : memref<16x128xf32, #tpu.memory_space<vmem>>, vector<16x128xf32>,
    } else {
    }
    return
  }
  func.func @transform_0(%arg0: i32, %arg1: i32, %arg2: i32) -> (i32, i32) {
    %c0_i32 = arith.constant 0 : i32
    return %arg0, %arg2 : i32, i32
  }
  func.func @transform_1(%arg0: i32, %arg1: i32, %arg2: i32) -> (i32, i32) {
    %c0_i32 = arith.constant 0 : i32
    return %arg1, %arg2 : i32, i32
  }
  func.func @transform_2(%arg0: i32, %arg1: i32, %arg2: i32) -> (i32, i32) {
    %c0_i32 = arith.constant 0 : i32
    %c0_i32_0 = arith.constant 0 : i32
    return %arg0, %c0_i32 : i32, i32
  }
  func.func @transform_3(%arg0: i32, %arg1: i32, %arg2: i32) -> (i32, i32) {
    %c0_i32 = arith.constant 0 : i32
    %c0_i32_0 = arith.constant 0 : i32
    return %c0_i32, %arg1 : i32, i32
  }
  func.func @transform_4(%arg0: i32, %arg1: i32, %arg2: i32) -> (i32, i32) {
    %c0_i32 = arith.constant 0 : i32
    return %arg0, %arg1 : i32, i32
  }
}

</mosaic_0001>

<bundles_post_ra>
// kernel: cclinear_repara.1
= control target key start
LH: loop header
LB: loop body
LE: loop exit
PB: predicated region body
PF: predicated region fallthrough
CT: control target
= control target key end

     0   :  { %v244_v3 = vmov 0   ;;  %s339_s1 = inlined_call_operand.vmem [shape: f32[128,128], index: 1, kind: input, shape index: {}]   ;;  %s340_s0 = inlined_call_operand.vmem [shape: f32[16,128], index: 0, kind: input, shape index: {}]   ;;  %s341_s2 = inlined_call_operand.vmem [shape: f32[16,1], index: 2, kind: input, shape index: {}]   ;;  %s342_s3 = inlined_call_operand.vmem [shape: f32[1,128], index: 3, kind: input, shape index: {}]   ;;  %s343_s4 = inlined_call_operand.vmem [shape: f32[16,128], index: 4, kind: output, shape index: {}]  }
   0x1   :  { %v27_v0 = vld [vmem:[%s339_s1] sm:$0xff]  ;;  %v28_v1 = vld [vmem:[%s339_s1 + $0x8] sm:$0xff]  ;;  %v29_v2 = vld [vmem:[%s339_s1 + $0x10] sm:$0xff]  ;;  %243 = vset.pattern.permute.xlu0 %v244_v3 }
   0x2   :  { %v210_v4 = vpack.c.bf16 %v28_v1, %v27_v0  ;;  %v30_v5 = vld [vmem:[%s339_s1 + $0x18] sm:$0xff]  ;;  %v25_v7 = vld [vmem:[%s340_s0] sm:$0xff]  ;;  %v32_v9 = vld [vmem:[%s339_s1 + $0x28] sm:$0xff] }
   0x3   :  { %v214_v6 = vpack.c.bf16 %v30_v5, %v29_v2  ;;  %v31_v8 = vld [vmem:[%s339_s1 + $0x20] sm:$0xff]  ;;  %207 = vmatprep.mubr.f32.mxu0 %v25_v7  ;;  %v128_v11 = vld [vmem:[%s341_s2 + $0x8] sm:$0xff]  ;;  %v33_v13 = vld [vmem:[%s339_s1 + $0x30] sm:$0xff] }
   0x4   :  { %211 = vmatprep.subr.bf16.mxu0 %v210_v4  ;;  %v127_v10 = vld [vmem:[%s341_s2] sm:$0xff]  ;;  %v218_v12 = vpack.c.bf16 %v32_v9, %v31_v8  ;;  %v34_v14 = vld [vmem:[%s339_s1 + $0x38] sm:$0xff]  ;;  %v36_v17 = vld [vmem:[%s339_s1 + $0x48] sm:$0xff] }
   0x5   :  { %213 = vmatpush3.bf16.xpose.msra.mxu0 %v210_v4  ;;  %131 = vperm.xlu0 %243, %v127_v10   ;;  %v222_v15 = vpack.c.bf16 %v34_v14, %v33_v13  ;;  %v35_v16 = vld [vmem:[%s339_s1 + $0x40] sm:$0xff]  ;;  %v37_v19 = vld [vmem:[%s339_s1 + $0x50] sm:$0xff]  ;;  %v38_v20 = vld [vmem:[%s339_s1 + $0x58] sm:$0xff] }
   0x6   :  { %215 = vmatprep.subr.bf16.mxu0 %v214_v6  ;;  %v226_v18 = vpack.c.bf16 %v36_v17, %v35_v16  ;;  %v230_v21 = vpack.c.bf16 %v38_v20, %v37_v19  ;;  %v39_v22 = vld [vmem:[%s339_s1 + $0x60] sm:$0xff]  ;;  %v40_v23 = vld [vmem:[%s339_s1 + $0x68] sm:$0xff]  ;;  %v41_v25 = vld [vmem:[%s339_s1 + $0x70] sm:$0xff] }
   0x7   :  { %v234_v24 = vpack.c.bf16 %v40_v23, %v39_v22  ;;  %v42_v26 = vld [vmem:[%s339_s1 + $0x78] sm:$0xff]  ;;  %v26_v28 = vld [vmem:[%s340_s0 + $0x8] sm:$0xff]  ;;  %v156_v32 = vld [vmem:[%s342_s3] ss:$0 sm:$0xff] }
   0x8   :  { %v238_v27 = vpack.c.bf16 %v42_v26, %v41_v25 }
   0x9   :  { %136 = vperm.xlu0 %243, %v128_v11  }
   0xd   :  { %217 = vmatpush3.bf16.xpose.msra.mxu0 %v214_v6 }
   0xe   :  { %219 = vmatprep.subr.bf16.mxu0 %v218_v12 }
  0x15   :  { %221 = vmatpush3.bf16.xpose.msra.mxu0 %v218_v12 }
  0x16   :  { %223 = vmatprep.subr.bf16.mxu0 %v222_v15 }
  0x1d   :  { %225 = vmatpush3.bf16.xpose.msra.mxu0 %v222_v15 }
  0x1e   :  { %227 = vmatprep.subr.bf16.mxu0 %v226_v18 }
  0x25   :  { %229 = vmatpush3.bf16.xpose.msra.mxu0 %v226_v18 }
  0x26   :  { %231 = vmatprep.subr.bf16.mxu0 %v230_v21 }
  0x2d   :  { %233 = vmatpush3.bf16.xpose.msra.mxu0 %v230_v21 }
  0x2e   :  { %235 = vmatprep.subr.bf16.mxu0 %v234_v24 }
  0x35   :  { %237 = vmatpush3.bf16.xpose.msra.mxu0 %v234_v24 }
  0x36   :  { %239 = vmatprep.subr.bf16.mxu0 %v238_v27 }
  0x3d   :  { %241 = vmatpush3.bf16.xpose.msra.mxu0 %v238_v27 }
  0x44   :  { %208 = vmatmul.mubr.f32.vlgmr.msra.gmra.mrb[0].mxu0 %v26_v28 }
  0x84   :  { %v132_v29 = vpop.permute.xlu0 %131 }
  0x88   :  { %v137_v30 = vpop.permute.xlu0 %136 }
 0x117   :  { %v209_v31 = vpop.f32.mrb[0].mxu0 }
 0x118   :  { %v140_v33 = vsub.f32 %v209_v31, %v137_v30  ;;  %v109_v34 = vpop.f32.mrb[1].mxu0 }
 0x119   :  { %v139_v35 = vsub.f32 %v109_v34, %v132_v29 }
 0x11a   :  { %v149_v36 = vadd.f32 %v156_v32, %v140_v33 }
 0x11b   :  { %v148_v37 = vadd.f32 %v156_v32, %v139_v35 }
 0x11c   :  { %151 = vst [vmem:[%s343_s4 + $0x8] sm:$0xff] %v149_v36 }
 0x11d   :  { %150 = vst [vmem:[%s343_s4] sm:$0xff] %v148_v37 }

</bundles_post_ra>
